<compile_context>
chip_gen: v7x
topology: tpu7x:2x2x1
jax: 0.10.0
libtpu: 0.0.40
codegen_flags: <defaults>
</compile_context>

<pallas_src>
import functools

import jax
import jax.numpy as jnp
from jax.experimental import pallas as pl
from jax.experimental.pallas import tpu as pltpu


def _spectral_attention_kernel(x_ref, w1t_ref, b1_ref, w2t_ref, b2_ref, o_ref,
                               *, inv_hw):
    # Global average pool over the spatial (lane) axis, f32 accumulation.
    x = x_ref[...]                                             # (BB, C, HW)
    pool = jnp.sum(x.astype(jnp.float32), axis=-1) * inv_hw    # (BB, C)

    # "conv1" on a length-1 zero-padded sequence == center-tap matmul + bias,
    # then sigmoid; "conv2" == 1x1 conv == dense matmul + bias, then relu.
    # Both are batched over BB: (BB, C_in) @ (C_in, C_out).
    z1 = jax.nn.sigmoid(
        jnp.dot(pool, w1t_ref[...], preferred_element_type=jnp.float32)
        + b1_ref[...])                                         # (BB, C)
    z2 = jnp.maximum(
        jnp.dot(z1, w2t_ref[...], preferred_element_type=jnp.float32)
        + b2_ref[...], 0.0)                                    # (BB, C)

    # Channel-wise rescale (broadcast over the lane/spatial axis).  Re-read
    # x_ref so the whole block isn't kept live across the reduce/matmul region.
    scale = z2.astype(o_ref.dtype)
    o_ref[...] = x_ref[...] * scale[:, :, None]


def _pick_batches_per_block(b, per_batch_bytes, target_bytes=4 << 20):
    """Largest divisor of b whose block stays around target_bytes."""
    bb = int(max(1, min(b, target_bytes // max(per_batch_bytes, 1))))
    while b % bb != 0:
        bb -= 1
    return bb


def spectral_attention(x, conv1_w, conv1_b, conv2_w, conv2_b):
    """x: (B, C, H, W) NCHW; conv1_w: (C, C, K); conv2_w: (C, C, 1)."""
    b, c, h, w = x.shape
    k = conv1_w.shape[-1]
    # Center-tap reduction of conv1 is exact only for odd K (PyTorch's
    # padding=(K-1)//2 keeps the length-1 sequence length 1).
    assert k % 2 == 1, "kernel_size must be odd"
    pad = (k - 1) // 2

    # Pre-transpose so the kernel does (BB, C_in) @ (C_in, C_out) directly.
    w1t = jnp.asarray(conv1_w[:, :, pad].T, dtype=jnp.float32)   # (C_in, C_out)
    w2t = jnp.asarray(conv2_w[:, :, 0].T, dtype=jnp.float32)     # (C_in, C_out)
    b1 = jnp.asarray(conv1_b, dtype=jnp.float32).reshape(1, c)
    b2 = jnp.asarray(conv2_b, dtype=jnp.float32).reshape(1, c)

    hw = h * w
    x_flat = x.reshape(b, c, hw)
    itemsize = x_flat.dtype.itemsize

    per_batch_bytes = c * hw * itemsize
    bb = _pick_batches_per_block(b, per_batch_bytes)
    num_blocks = b // bb
    block_bytes = bb * per_batch_bytes
    param_bytes = (2 * c * c + 2 * c) * 4

    # Generation-aware VMEM budget: double-buffered in + out blocks + resident
    # params + slack, floored at 16 MiB, capped at ~75% of physical VMEM.
    try:
        vmem_cap = int(pltpu.get_tpu_info().vmem_capacity_bytes)
    except Exception:  # pragma: no cover - conservative fallback (v7x per-TC)
        vmem_cap = 64 * 1024 * 1024
    vmem_budget = int(min((3 * vmem_cap) // 4,
                          max(4 * block_bytes + param_bytes + (1 << 20),
                              16 * 1024 * 1024)))

    cost = pl.CostEstimate(
        flops=int(b * (2 * 2 * c * c + 2 * c * hw)),       # two CxC matmuls + pool/rescale
        transcendentals=int(b * c),                        # sigmoid
        bytes_accessed=int(2 * b * c * hw * itemsize))     # stream x in, out back

    kernel = functools.partial(_spectral_attention_kernel, inv_hw=1.0 / float(hw))

    out = pl.pallas_call(
        kernel,
        out_shape=jax.ShapeDtypeStruct((b, c, hw), x.dtype),
        grid=(num_blocks,),
        in_specs=[
            pl.BlockSpec((bb, c, hw), lambda i: (i, 0, 0)),   # x: streamed per block
            pl.BlockSpec((c, c), lambda i: (0, 0)),           # w1^T: VMEM-resident
            pl.BlockSpec((1, c), lambda i: (0, 0)),           # b1:   VMEM-resident
            pl.BlockSpec((c, c), lambda i: (0, 0)),           # w2^T: VMEM-resident
            pl.BlockSpec((1, c), lambda i: (0, 0)),           # b2:   VMEM-resident
        ],
        out_specs=pl.BlockSpec((bb, c, hw), lambda i: (i, 0, 0)),
        compiler_params=pltpu.CompilerParams(
            dimension_semantics=("parallel",),
            vmem_limit_bytes=vmem_budget),
        cost_estimate=cost,
    )(x_flat, w1t, b1, w2t, b2)

    return out.reshape(b, c, h, w)


def _reference(x, conv1_w, conv1_b, conv2_w, conv2_b):
    k = conv1_w.shape[-1]
    pool = x.mean(axis=(2, 3))                                   # (B, C)
    z1 = jax.nn.sigmoid(pool @ conv1_w[:, :, (k - 1) // 2].T + conv1_b)
    z2 = jnp.maximum(z1 @ conv2_w[:, :, 0].T + conv2_b, 0.0)
    return x * z2[:, :, None, None]


def _run_case(key, b, c, h, w, k):
    kx, k1, k2, k3, k4 = jax.random.split(key, 5)
    x = jax.random.normal(kx, (b, c, h, w), dtype=jnp.float32)
    conv1_w = jax.random.normal(k1, (c, c, k), dtype=jnp.float32) * 0.2
    conv1_b = jax.random.normal(k2, (c,), dtype=jnp.float32) * 0.1
    conv2_w = jax.random.normal(k3, (c, c, 1), dtype=jnp.float32) * 0.2
    conv2_b = jax.random.normal(k4, (c,), dtype=jnp.float32) * 0.1

    out = spectral_attention(x, conv1_w, conv1_b, conv2_w, conv2_b)
    out = jax.block_until_ready(out)
    ref = _reference(x, conv1_w, conv1_b, conv2_w, conv2_b)

    assert out.shape == (b, c, h, w)
    assert jnp.allclose(out, ref, atol=1e-5, rtol=1e-5), "mismatch vs reference"


if __name__ == "__main__":
    key = jax.random.PRNGKey(0)
    key_a, key_b = jax.random.split(key)
    # Primary case (matches the module's intended small shapes): H*W is a
    # multiple of 128 -> lane-dense, both batches land in one block.
    _run_case(key_a, b=2, c=4, h=16, w=16, k=3)
    # Secondary case exercising the ragged spatial path (7x7 = 49 lanes, no
    # wrapper padding; Mosaic masks the tail, mean divides by the true H*W).
    _run_case(key_b, b=2, c=8, h=7, w=7, k=5)
    print("KERNEL_OK")
</pallas_src>

<mosaic_0001>
module attributes {stable_mosaic.version = 11 : i64} {
  func.func @_spectral_attention_kernel(%arg0: i32, %arg1: memref<2x4x256xf32, #tpu.memory_space<vmem>>, %arg2: memref<4x4xf32, #tpu.memory_space<vmem>>, %arg3: memref<1x4xf32, #tpu.memory_space<vmem>>, %arg4: memref<4x4xf32, #tpu.memory_space<vmem>>, %arg5: memref<1x4xf32, #tpu.memory_space<vmem>>, %arg6: memref<2x4x256xf32, #tpu.memory_space<vmem>>) attributes {dimension_semantics = [#tpu.dimension_semantics<parallel>], iteration_bounds = array<i64: 1>, scalar_prefetch = 0 : i64, scratch_operands = 0 : i64, tpu.core_type = #tpu.core_type<tc>, window_params = [{transform_indices = @transform_0, window_bounds = array<i64: 2, 4, 256>}, {pipeline_mode = #tpu.pipeline_mode<synchronous>, transform_indices = @transform_1, window_bounds = array<i64: 4, 4>}, {pipeline_mode = #tpu.pipeline_mode<synchronous>, transform_indices = @transform_2, window_bounds = array<i64: 1, 4>}, {pipeline_mode = #tpu.pipeline_mode<synchronous>, transform_indices = @transform_3, window_bounds = array<i64: 4, 4>}, {pipeline_mode = #tpu.pipeline_mode<synchronous>, transform_indices = @transform_4, window_bounds = array<i64: 1, 4>}, {transform_indices = @transform_5, window_bounds = array<i64: 2, 4, 256>}]} {
    %c0 = arith.constant 0 : index
    %c0_0 = arith.constant 0 : index
    %c0_1 = arith.constant 0 : index
    %0 = vector.load %arg1[%c0, %c0_0, %c0_1] : memref<2x4x256xf32, #tpu.memory_space<vmem>>, vector<2x4x256xf32>
    %cst = arith.constant dense<0.000000e+00> : vector<2x4xf32>
    %1 = vector.multi_reduction <add>, %0, %cst [2] : vector<2x4x256xf32> to vector<2x4xf32>
    %cst_2 = arith.constant 3.906250e-03 : f32
    %2 = vector.broadcast %cst_2 : f32 to vector<2x4xf32>
    %3 = arith.mulf %1, %2 : vector<2x4xf32>
    %c0_3 = arith.constant 0 : index
    %c0_4 = arith.constant 0 : index
    %4 = vector.load %arg2[%c0_3, %c0_4] : memref<4x4xf32, #tpu.memory_space<vmem>>, vector<4x4xf32>
    %cst_5 = arith.constant dense<0.000000e+00> : vector<2x4xf32>
    %5 = tpu.matmul %3, %4, %cst_5 {dimension_numbers = #tpu.dot_dimension_numbers<[1], [0], [0], [1], [0, 0, 1, 1], [], []>} : vector<2x4xf32>, vector<4x4xf32>, vector<2x4xf32> -> vector<2x4xf32>
    %c0_6 = arith.constant 0 : index
    %c0_7 = arith.constant 0 : index
    %6 = vector.load %arg3[%c0_6, %c0_7] : memref<1x4xf32, #tpu.memory_space<vmem>>, vector<1x4xf32>
    %7 = vector.broadcast %6 : vector<1x4xf32> to vector<2x4xf32>
    %8 = arith.addf %5, %7 : vector<2x4xf32>
    %9 = arith.negf %8 : vector<2x4xf32>
    %10 = math.exp %9 : vector<2x4xf32>
    %cst_8 = arith.constant 1.000000e+00 : f32
    %11 = vector.broadcast %cst_8 : f32 to vector<2x4xf32>
    %12 = arith.addf %11, %10 : vector<2x4xf32>
    %13 = arith.divf %11, %12 : vector<2x4xf32>
    %c0_9 = arith.constant 0 : index
    %c0_10 = arith.constant 0 : index
    %14 = vector.load %arg4[%c0_9, %c0_10] : memref<4x4xf32, #tpu.memory_space<vmem>>, vector<4x4xf32>
    %cst_11 = arith.constant dense<0.000000e+00> : vector<2x4xf32>
    %15 = tpu.matmul %13, %14, %cst_11 {dimension_numbers = #tpu.dot_dimension_numbers<[1], [0], [0], [1], [0, 0, 1, 1], [], []>} : vector<2x4xf32>, vector<4x4xf32>, vector<2x4xf32> -> vector<2x4xf32>
    %c0_12 = arith.constant 0 : index
    %c0_13 = arith.constant 0 : index
    %16 = vector.load %arg5[%c0_12, %c0_13] : memref<1x4xf32, #tpu.memory_space<vmem>>, vector<1x4xf32>
    %17 = vector.broadcast %16 : vector<1x4xf32> to vector<2x4xf32>
    %18 = arith.addf %15, %17 : vector<2x4xf32>
    %cst_14 = arith.constant 0.000000e+00 : f32
    %19 = vector.broadcast %cst_14 : f32 to vector<2x4xf32>
    %20 = arith.maximumf %18, %19 : vector<2x4xf32>
    %c0_15 = arith.constant 0 : index
    %c0_16 = arith.constant 0 : index
    %c0_17 = arith.constant 0 : index
    %21 = vector.load %arg1[%c0_15, %c0_16, %c0_17] : memref<2x4x256xf32, #tpu.memory_space<vmem>>, vector<2x4x256xf32>
    %22 = vector.shape_cast %20 : vector<2x4xf32> to vector<2x4x1xf32>
    %23 = vector.broadcast %22 : vector<2x4x1xf32> to vector<2x4x256xf32>
    %24 = arith.mulf %21, %23 : vector<2x4x256xf32>
    %c0_18 = arith.constant 0 : index
    %c0_19 = arith.constant 0 : index
    %c0_20 = arith.constant 0 : index
    %25 = vector.load %arg6[%c0_18, %c0_19, %c0_20] : memref<2x4x256xf32, #tpu.memory_space<vmem>>, vector<2x4x256xf32>
    tpu.vector_store %arg6[%c0_18, %c0_19, %c0_20], %24 {strides = array<i32>} : memref<2x4x256xf32, #tpu.memory_space<vmem>>, vector<2x4x256xf32>,
    return
  }
  func.func @transform_0(%arg0: i32) -> (i32, i32, i32) {
    %c0_i32 = arith.constant 0 : i32
    %c0_i32_0 = arith.constant 0 : i32
    %c0_i32_1 = arith.constant 0 : i32
    return %arg0, %c0_i32, %c0_i32_0 : i32, i32, i32
  }
  func.func @transform_1(%arg0: i32) -> (i32, i32) {
    %c0_i32 = arith.constant 0 : i32
    %c0_i32_0 = arith.constant 0 : i32
    %c0_i32_1 = arith.constant 0 : i32
    return %c0_i32, %c0_i32_0 : i32, i32
  }
  func.func @transform_2(%arg0: i32) -> (i32, i32) {
    %c0_i32 = arith.constant 0 : i32
    %c0_i32_0 = arith.constant 0 : i32
    %c0_i32_1 = arith.constant 0 : i32
    return %c0_i32, %c0_i32_0 : i32, i32
  }
  func.func @transform_3(%arg0: i32) -> (i32, i32) {
    %c0_i32 = arith.constant 0 : i32
    %c0_i32_0 = arith.constant 0 : i32
    %c0_i32_1 = arith.constant 0 : i32
    return %c0_i32, %c0_i32_0 : i32, i32
  }
  func.func @transform_4(%arg0: i32) -> (i32, i32) {
    %c0_i32 = arith.constant 0 : i32
    %c0_i32_0 = arith.constant 0 : i32
    %c0_i32_1 = arith.constant 0 : i32
    return %c0_i32, %c0_i32_0 : i32, i32
  }
  func.func @transform_5(%arg0: i32) -> (i32, i32, i32) {
    %c0_i32 = arith.constant 0 : i32
    %c0_i32_0 = arith.constant 0 : i32
    %c0_i32_1 = arith.constant 0 : i32
    return %arg0, %c0_i32, %c0_i32_0 : i32, i32, i32
  }
}

</mosaic_0001>

<bundles_post_ra>
// kernel: tpu_custom_call.1
= control target key start
LH: loop header
LB: loop body
LE: loop exit
PB: predicated region body
PF: predicated region fallthrough
CT: control target
= control target key end

     0   :  { %10 = vsyncpa [#allocation3], 0  ;;  %s525_s0 = inlined_call_operand.hbm [shape: f32[2,4,256], index: 0, kind: input, shape index: {}]   ;;  %s526_s1 = inlined_call_operand.hbm [shape: f32[4,4], index: 1, kind: input, shape index: {}]   ;;  %s527_s2 = inlined_call_operand.vmem [shape: f32[1,4], index: 2, kind: input, shape index: {}]   ;;  %s528_s3 = inlined_call_operand.vmem [shape: f32[4,4], index: 3, kind: input, shape index: {}]   ;;  %s529_s4 = inlined_call_operand.vmem [shape: f32[1,4], index: 4, kind: input, shape index: {}]   ;;  %s530_s5 = inlined_call_operand.hbm [shape: f32[2,4,256], index: 5, kind: output, shape index: {}]  }
   0x1   :  { %11 = vsyncpa [#allocation6], 0 }
   0x2   :  { %12 = vsyncpa [#allocation4], 0  ;;  %s418_s18 = smov [#allocation2]   ;;  %s346_s22 = scalar_lea.hbm %s525_s0, 256 }
   0x3   :  { %s18_s19 = sshll.u32 %s418_s18, 4  ;;  %p347_p0 = scmp.ne.s32.totalorder %s525_s0, %s346_s22  ;;  %s19_s19 = int_to_ptr.vmem [resolvable:$true] %s18_s19 }
   0x4   :  { %p350_p1 = scmp.lt.u32.totalorder %s346_s22, %s525_s0 }
   0x6   :  { %p352_p2 = pnand %p350_p1, %p347_p0 }
   0x8   :  { %355 = shalt.err (!%p352_p2)
}
   0x9   :  { %s356_s27 = scalar_lea.vmem %s19_s19, 256  ;;  %p361_p4 = scmp.lt.s32.totalorder %s19_s19, %s19_s19 }
   0xa   :  { %p357_p3 = scmp.ne.s32.totalorder %s19_s19, %s356_s27  ;;  %p362_p5 = scmp.lt.s32.totalorder %s356_s27, %s356_s27 }
   0xc   :  { %p363_p6 = por %p362_p5, %p361_p4 }
   0xe   :  { %p364_p7 = pnand %p363_p6, %p357_p3 }
  0x10   :  { %367 = shalt.err (!%p364_p7)
}
  0x11   :  { %s419_s28 = smov 128   ;;  %s420_s29 = smov 8  }
  0x12   :  { %24 = dma.hbm_to_vmem [thread:$0]  %s525_s0, 256, %s19_s19, [#allocation3], %s419_s28, %s419_s28, %s420_s29  }
  0x13   :  { %s421_s7 = smov [#allocation5]   ;;  %s368_s11 = scalar_lea.hbm %s526_s1, 64 }
  0x14   :  { %s31_s8 = sshll.u32 %s421_s7, 4  ;;  %p369_p8 = scmp.ne.s32.totalorder %s526_s1, %s368_s11  ;;  %s32_s8 = int_to_ptr.vmem [resolvable:$true] %s31_s8 }
  0x15   :  { %p372_p9 = scmp.lt.u32.totalorder %s368_s11, %s526_s1 }
  0x17   :  { %p374_p10 = pnand %p372_p9, %p369_p8 }
  0x19   :  { %377 = shalt.err (!%p374_p10)
}
  0x1a   :  { %s378_s16 = scalar_lea.vmem %s32_s8, 64  ;;  %p383_p12 = scmp.lt.s32.totalorder %s32_s8, %s32_s8 }
  0x1b   :  { %p379_p11 = scmp.ne.s32.totalorder %s32_s8, %s378_s16  ;;  %p384_p13 = scmp.lt.s32.totalorder %s378_s16, %s378_s16 }
  0x1d   :  { %p385_p0 = por %p384_p13, %p383_p12 }
  0x1f   :  { %p386_p1 = pnand %p385_p0, %p379_p11 }
  0x21   :  { %389 = shalt.err (!%p386_p1)
}
  0x22   :  { %34 = dma.hbm_to_vmem [thread:$0]  %s526_s1, 64, %s32_s8, [#allocation6]  }
  0x23   :  { %412 = dma.done.wait [#allocation3], 256  }
  0x24   :  { %413 = vsyncadd [#allocation3], 4294967040 }
  0x25   :  { %414 = dma.done.wait [#allocation6], 64  }
  0x26   :  { %415 = vsyncadd [#allocation6], 4294967232  ;;  %vm55_vm0 = vcmask 1043456   ;;  %v483_v0 = vld [vmem:[#allocation2] sm:$0xff]  ;;  %v485_v1 = vld [vmem:[#allocation2 + $0x8] sm:$0xff]  ;;  %v422_v11 = vmov 0.0   ;;  %v78_v12 = vlaneseq }
  0x27   :  { %v51_v2 = vcombine.high %v483_v0, %v483_v0  ;;  %v56_v3 = vsel %vm55_vm0, %v483_v0, 0.0  ;;  %v52_v4 = vcombine.high %v485_v1, %v485_v1  ;;  %v61_v6 = vsel %vm55_vm0, %v485_v1, 0.0  ;;  %v68_v10 = vld [vmem:[#allocation5] sm:$0xf]  ;;  %322 = vmatprep.subr.mxu0 %v422_v11  ;;  %327 = vmatprep.subr.mxu1 %v422_v11  ;;  %v172_v23 = vld [vmem:[%s528_s3] sm:$0xf] }
  0x28   :  { %vm423_vm1 = vmmov 0   ;;  %323 = vmatpush3.msk.msra.mxu0 %vm55_vm0, %v68_v10  ;;  %v79_v13 = vand.u32 127, %v78_v12  ;;  %v81_v14 = vshrl.u32 %v78_v12, 7  ;;  %vm88_vm2 = vcmask 1041409   ;;  %328 = vmatpush3.msk.msra.mxu1 %vm55_vm0, %v172_v23  ;;  %v311_v24 = vld [vmem:[%s527_s2] ss:$0 sm:$0xff] }
  0x29   :  { %v57_v5 = vsel %vm55_vm0, %v51_v2, 0.0  ;;  %v62_v7 = vsel %vm55_vm0, %v52_v4, 0.0  ;;  %324 = vmatprep.mubr.msk.f32.mxu0 %vm423_vm1, %v422_v11  ;;  %329 = vmatprep.mubr.msk.f32.mxu1 %vm423_vm1, %v422_v11  ;;  %vm90_vm3 = vcmask 31744   ;;  %v315_v32 = vld [vmem:[%s529_s4] ss:$0 sm:$0xff]  ;;  %s425_s2 = smov [#allocation7]  }
  0x2a   :  { %v58_v8 = vadd.f32 %v57_v5, %v56_v3  ;;  %v63_v9 = vadd.f32 %v62_v7, %v61_v6  ;;  %v82_v16 = vsub.s32 %v79_v13, %v81_v14  ;;  %v259_v36 = vsub.s32 0, %v81_v14  ;;  %s298_s3 = sshll.u32 %s425_s2, 4  ;;  %s299_s3 = int_to_ptr.vmem [resolvable:$true] %s298_s3 }
  0x2b   :  { %v266_v39 = vsub.s32 1, %v81_v14  ;;  %v424_v41 = vmov 839922192   ;;  %s390_s4 = scalar_lea.vmem %s299_s3, 256  ;;  %p395_p3 = scmp.lt.s32.totalorder %s299_s3, %s299_s3 }
  0x2c   :  { %59 = vadd.xlane.f32.xlu0 %v58_v8  ;;  %v274_v42 = vunpack.c.l.s4 %v424_v41  ;;  %p391_p2 = scmp.ne.s32.totalorder %s299_s3, %s390_s4  ;;  %p396_p4 = scmp.lt.s32.totalorder %s390_s4, %s390_s4 }
  0x2e   :  { %v275_v43 = vunpack.c.0.s8 %v274_v42  ;;  %p397_p5 = por %p396_p4, %p395_p3 }
  0x30   :  { %64 = vadd.xlane.f32.xlu0 %v63_v9  ;;  %v278_v44 = vsub.s32 %v275_v43, %v81_v14  ;;  %p398_p6 = pnand %p397_p5, %p391_p2 }
  0xb9   :  { %v60_v15 = vpop.xlane.xlu0 %59 }
  0xba   :  { %v66_v17 = vmul.f32 0.00390625, %v60_v15 }
  0xbc   :  { %v83_v20 = vrot.slane %v66_v17, %v82_v16 }
  0xbd   :  { %v65_v18 = vpop.xlane.xlu0 %64 }
  0xbe   :  { %v67_v19 = vmul.f32 0.00390625, %v65_v18 }
  0xc0   :  { %v87_v21 = vrot.slane %v67_v19, %v82_v16 }
  0xc2   :  { %v89_v22 = vsel %vm88_vm2, %v87_v21, %v83_v20 }
  0xc3   :  { %325 = vmatmul.mubr.msk.f32.vlgmr.msra.gmra.mrb[0].mxu0 %vm90_vm3, %v89_v22 }
 0x196   :  { %v162_v25 = vpop.f32.mrb[0].mxu0 }
 0x197   :  { %v163_v26 = vadd.f32 %v311_v24, %v162_v25  ;;  %v326_v27 = vpop.f32.mrb[1].mxu0 }
 0x199   :  { %v314_v28 = vmul.f32 -1.442695, %v163_v26 }
 0x19b   :  { %342 = vpow2.f32 %v314_v28 }
 0x1a5   :  { %v343_v29 = vpop.eup %342 }
 0x1a6   :  { %v169_v30 = vadd.f32 1.0, %v343_v29 }
 0x1a8   :  { %344 = vrcp.f32 %v169_v30 }
 0x1b2   :  { %v345_v31 = vpop.eup %344 }
 0x1b3   :  { %330 = vmatmul.mubr.msk.f32.vlgmr.msra.gmra.mrb[0].mxu1 %vm90_vm3, %v345_v31 }
 0x286   :  { %v252_v33 = vpop.f32.mrb[0].mxu1 }
 0x287   :  { %v253_v34 = vadd.f32 %v315_v32, %v252_v33  ;;  %v331_v35 = vpop.f32.mrb[1].mxu1 }
 0x289   :  { %v256_v37 = vmax.f32 %v253_v34, 0.0 }
 0x28b   :  { %v260_v38 = vrot.slane %v256_v37, %v259_v36  ;;  %v267_v40 = vrot.slane %v256_v37, %v266_v39 }
 0x28d   :  { %262 = vbcast.lane.b32.xlu1 %v260_v38, 256 }
 0x291   :  { %269 = vbcast.lane.b32.xlu1 %v267_v40, 256 }
 0x2ff   :  { %v263_v45 = vpop.permute.xlu1 %262 }
 0x300   :  { %v279_v46 = vrot.slane %v263_v45, %v278_v44 }
 0x302   :  { %v289_v47 = vmul.f32 %v279_v46, %v483_v0 }
 0x303   :  { %v270_v48 = vpop.permute.xlu1 %269 }
 0x304   :  { %291 = vst [vmem:[#allocation7] sm:$0xff] %v289_v47  ;;  %v286_v49 = vrot.slane %v270_v48, %v278_v44 }
 0x306   :  { %v290_v50 = vmul.f32 %v286_v49, %v485_v1 }
 0x308   :  { %292 = vst [vmem:[#allocation7 + $0x8] sm:$0xff] %v290_v50 }
 0x309   :  { %401 = shalt.err (!%p398_p6)
}
 0x30a   :  { %s402_s25 = scalar_lea.hbm %s530_s5, 256 }
 0x30b   :  { %p403_p7 = scmp.ne.s32.totalorder %s530_s5, %s402_s25  ;;  %p406_p8 = scmp.lt.u32.totalorder %s402_s25, %s530_s5 }
 0x30d   :  { %p408_p9 = pnand %p406_p8, %p403_p7 }
 0x30f   :  { %411 = shalt.err (!%p408_p9)
}
 0x310   :  { %304 = dma.vmem_to_hbm [thread:$0]  %s299_s3, 256, %s530_s5, [#allocation4], %s419_s28, %s419_s28, %s420_s29  }
 0x311   :  { %416 = dma.done.wait [#allocation4], 256  }
 0x312   :  { %417 = vsyncadd [#allocation4], 4294967040 }
 0x313   :  { %308 = vsyncpa [#allocation3], 1 }
 0x314   :  { %309 = vsyncpa [#allocation6], 1 }
 0x315   :  { %310 = vsyncpa [#allocation4], 1 }

</bundles_post_ra>
